<compile_context>
chip_gen: v5e
topology: v5e:2x2
jax: 0.10.0
libtpu: 0.0.40
codegen_flags: <defaults>
</compile_context>

<pallas_src>
import functools

import jax
import jax.numpy as jnp
from jax import lax
from jax.experimental import pallas as pl
from jax.experimental.pallas import tpu as pltpu


def _contra_loss_kernel(pred_ref, label_ref, out_ref, *, threshold, tb, b_true):
    """One grid step == one block of TB samples (rows of length H*W).

    Writes the block's partial sum of per-row losses to its own (1,1) output
    block.  Rows past the true batch size (ragged tail block) are masked to 0.
    """
    g = pl.program_id(0)

    pred = pred_ref[...].astype(jnp.float32)     # (TB, HW)
    label = label_ref[...].astype(jnp.float32)   # (TB, HW)

    # Per-sample max over the (flattened) spatial axis.
    shift = jnp.max(pred, axis=-1, keepdims=True)            # (TB, 1)
    p_exp = jnp.exp(pred - shift)                             # (TB, HW)

    sum_all = jnp.sum(p_exp, axis=-1, keepdims=True)          # (TB, 1)
    # positive_mask = (label >= threshold), fused into a select.
    sum_pos = jnp.sum(jnp.where(label >= threshold, p_exp, 0.0),
                      axis=-1, keepdims=True)                 # (TB, 1)

    row_loss = (jnp.log(jnp.maximum(sum_all, 1e-7))
                - jnp.log(jnp.maximum(sum_pos, 1e-7)))        # (TB, 1)

    # Mask rows beyond the true batch size (the last block may be ragged and
    # its out-of-bounds rows contain unspecified data; NaNs there are safely
    # discarded by the select).
    row_ids = lax.broadcasted_iota(jnp.int32, (tb, 1), 0) + g * tb
    row_loss = jnp.where(row_ids < b_true, row_loss, 0.0)

    out_ref[...] = jnp.sum(row_loss, axis=(0, 1), keepdims=True)  # (1, 1)


def contra_loss(prediction, label, threshold=0.05, clip=None):
    """Pallas implementation of ContraLoss.forward."""
    assert prediction.shape == label.shape, "prediction/label must match"
    H, W = prediction.shape[-2], prediction.shape[-1]
    HW = H * W

    pred = prediction.reshape(-1, HW)
    lab = label.reshape(-1, HW)
    B = pred.shape[0]

    itemsize = jnp.dtype(pred.dtype).itemsize
    # Packed sublane tile: 8 for f32, 16 for bf16, 32 for int8/fp8.
    sublane = max(8, 32 // itemsize)

    # ~8 MiB per input block (2 inputs x 2 pipeline buffers ~= 34 MiB), capped
    # by the batch size rounded up to the sublane tile.
    target_bytes = 8 << 20
    per_row_bytes = max(1, HW * itemsize)
    b_up = ((B + sublane - 1) // sublane) * sublane
    tb = (target_bytes // per_row_bytes) // sublane * sublane
    tb = max(sublane, min(tb, b_up))
    # TODO(synk): for very large score maps (f32 H=W>=724) even a sublane-high
    # block exceeds v7x's 64 MiB VMEM with double buffering; that case needs a
    # second grid axis over HW with an online logsumexp.

    G = (B + tb - 1) // tb  # ragged tail handled by in-kernel row mask

    block_bytes = tb * HW * itemsize
    vmem_limit = max(32 << 20, min(4 * block_bytes + (2 << 20), 64 << 20))

    kernel = functools.partial(_contra_loss_kernel,
                               threshold=float(threshold), tb=tb, b_true=B)

    partials = pl.pallas_call(
        kernel,
        out_shape=jax.ShapeDtypeStruct((G, 1), jnp.float32),
        grid_spec=pltpu.PrefetchScalarGridSpec(
            num_scalar_prefetch=0,
            grid=(G,),
            in_specs=[
                pl.BlockSpec((tb, HW), lambda g: (g, 0)),
                pl.BlockSpec((tb, HW), lambda g: (g, 0)),
            ],
            out_specs=pl.BlockSpec((1, 1), lambda g: (g, 0)),
        ),
        compiler_params=pltpu.CompilerParams(
            dimension_semantics=("parallel",),
            vmem_limit_bytes=vmem_limit,
        ),
    )(pred, lab)

    # Masked tail rows contributed exactly 0; divide by the TRUE batch size.
    loss = jnp.sum(partials) / jnp.float32(B)
    if clip is not None:
        loss = jnp.minimum(loss, jnp.float32(clip))
    return loss


def contra_loss_ref(prediction, label, threshold=0.05, clip=None):
    """Pure-JAX reference matching the PyTorch forward."""
    negative_mask = (label < threshold).astype(jnp.float32)
    positive_mask = 1.0 - negative_mask
    shift = jnp.max(jnp.max(prediction, axis=-1, keepdims=True),
                    axis=-2, keepdims=True)
    p_exp = jnp.exp(prediction - shift)
    log_sum = jnp.log(jnp.maximum(jnp.sum(p_exp, axis=(-2, -1)), 1e-7))
    log_pos = jnp.log(jnp.maximum(jnp.sum(p_exp * positive_mask,
                                          axis=(-2, -1)), 1e-7))
    loss = jnp.mean(log_sum - log_pos)
    if clip is not None:
        loss = jnp.minimum(loss, jnp.float32(clip))
    return loss


if __name__ == "__main__":
    key = jax.random.PRNGKey(0)
    k1, k2, k3, k4 = jax.random.split(key, 4)

    # Test 1: plain (B, H, W) score maps.
    B, H, W = 2, 16, 16
    prediction = jax.random.normal(k1, (B, H, W), dtype=jnp.float32)
    label = jax.random.uniform(k2, (B, H, W), dtype=jnp.float32)
    loss = jax.block_until_ready(contra_loss(prediction, label, threshold=0.05))
    ref = contra_loss_ref(prediction, label, threshold=0.05)
    assert jnp.allclose(loss, ref, rtol=1e-5, atol=1e-5), (loss, ref)

    # Test 2: extra leading dims, batch (15 rows) not a multiple of the
    # sublane tile (exercises the in-kernel tail mask), and clipping enabled.
    pred2 = jax.random.normal(k3, (3, 5, 16, 16), dtype=jnp.float32)
    lab2 = jax.random.uniform(k4, (3, 5, 16, 16), dtype=jnp.float32)
    loss2 = jax.block_until_ready(
        contra_loss(pred2, lab2, threshold=0.05, clip=2.0))
    ref2 = contra_loss_ref(pred2, lab2, threshold=0.05, clip=2.0)
    assert jnp.allclose(loss2, ref2, rtol=1e-5, atol=1e-5), (loss2, ref2)

    print("KERNEL_OK")
</pallas_src>

<mosaic_0001>
module attributes {stable_mosaic.version = 11 : i64} {
  func.func @_contra_loss_kernel(%arg0: i32, %arg1: memref<8x256xf32, #tpu.memory_space<vmem>>, %arg2: memref<8x256xf32, #tpu.memory_space<vmem>>, %arg3: memref<1x1xf32, #tpu.memory_space<vmem>>) attributes {dimension_semantics = [#tpu.dimension_semantics<parallel>], iteration_bounds = array<i64: 1>, scalar_prefetch = 0 : i64, scratch_operands = 0 : i64, tpu.core_type = #tpu.core_type<tc>, window_params = [{transform_indices = @transform_0, window_bounds = array<i64: 8, 256>}, {transform_indices = @transform_1, window_bounds = array<i64: 8, 256>}, {transform_indices = @transform_2, window_bounds = array<i64: 1, 1>}]} {
    %c0 = arith.constant 0 : index
    %c0_0 = arith.constant 0 : index
    %0 = vector.load %arg1[%c0, %c0_0] : memref<8x256xf32, #tpu.memory_space<vmem>>, vector<8x256xf32>
    %c0_1 = arith.constant 0 : index
    %c0_2 = arith.constant 0 : index
    %1 = vector.load %arg2[%c0_1, %c0_2] : memref<8x256xf32, #tpu.memory_space<vmem>>, vector<8x256xf32>
    %cst = arith.constant dense<0xFF800000> : vector<8xf32>
    %2 = vector.multi_reduction <maximumf>, %0, %cst [1] : vector<8x256xf32> to vector<8xf32>
    %3 = vector.shape_cast %2 : vector<8xf32> to vector<8x1xf32>
    %4 = vector.broadcast %3 : vector<8x1xf32> to vector<8x256xf32>
    %5 = arith.subf %0, %4 : vector<8x256xf32>
    %6 = math.exp %5 : vector<8x256xf32>
    %cst_3 = arith.constant dense<0.000000e+00> : vector<8xf32>
    %7 = vector.multi_reduction <add>, %6, %cst_3 [1] : vector<8x256xf32> to vector<8xf32>
    %8 = vector.shape_cast %7 : vector<8xf32> to vector<8x1xf32>
    %cst_4 = arith.constant 5.000000e-02 : f32
    %9 = vector.broadcast %cst_4 : f32 to vector<8x256xf32>
    %10 = arith.cmpf oge, %1, %9 : vector<8x256xf32>
    %cst_5 = arith.constant 0.000000e+00 : f32
    %11 = vector.broadcast %cst_5 : f32 to vector<8x256xf32>
    %12 = arith.select %10, %6, %11 : vector<8x256xi1>, vector<8x256xf32>
    %cst_6 = arith.constant dense<0.000000e+00> : vector<8xf32>
    %13 = vector.multi_reduction <add>, %12, %cst_6 [1] : vector<8x256xf32> to vector<8xf32>
    %14 = vector.shape_cast %13 : vector<8xf32> to vector<8x1xf32>
    %cst_7 = arith.constant 1.000000e-07 : f32
    %15 = vector.broadcast %cst_7 : f32 to vector<8x1xf32>
    %16 = arith.maximumf %8, %15 : vector<8x1xf32>
    %17 = math.log %16 : vector<8x1xf32>
    %cst_8 = arith.constant 1.000000e-07 : f32
    %18 = vector.broadcast %cst_8 : f32 to vector<8x1xf32>
    %19 = arith.maximumf %14, %18 : vector<8x1xf32>
    %20 = math.log %19 : vector<8x1xf32>
    %21 = arith.subf %17, %20 : vector<8x1xf32>
    %22 = tpu.iota {dimensions = array<i32: 0>} : vector<8x1xi32>
    %c8_i32 = arith.constant 8 : i32
    %23 = arith.muli %arg0, %c8_i32 : i32
    %24 = vector.broadcast %23 : i32 to vector<8x1xi32>
    %25 = arith.addi %22, %24 : vector<8x1xi32>
    %c2_i32 = arith.constant 2 : i32
    %26 = vector.broadcast %c2_i32 : i32 to vector<8x1xi32>
    %27 = arith.cmpi slt, %25, %26 : vector<8x1xi32>
    %cst_9 = arith.constant 0.000000e+00 : f32
    %28 = vector.broadcast %cst_9 : f32 to vector<8x1xf32>
    %29 = arith.select %27, %21, %28 : vector<8x1xi1>, vector<8x1xf32>
    %30 = vector.shape_cast %29 : vector<8x1xf32> to vector<1x8x1xf32>
    %cst_10 = arith.constant dense<0.000000e+00> : vector<1xf32>
    %31 = vector.multi_reduction <add>, %30, %cst_10 [1, 2] : vector<1x8x1xf32> to vector<1xf32>
    %32 = vector.shape_cast %31 : vector<1xf32> to vector<1x1x1xf32>
    %33 = vector.extract %32[0, 0, 0] : f32 from vector<1x1x1xf32>
    %34 = vector.broadcast %33 : f32 to vector<1x1xf32>
    %c0_11 = arith.constant 0 : index
    %c0_12 = arith.constant 0 : index
    %35 = vector.load %arg3[%c0_11, %c0_12] : memref<1x1xf32, #tpu.memory_space<vmem>>, vector<1x1xf32>
    tpu.vector_store %arg3[%c0_11, %c0_12], %34 {strides = array<i32>} : memref<1x1xf32, #tpu.memory_space<vmem>>, vector<1x1xf32>,
    return
  }
  func.func @transform_0(%arg0: i32) -> (i32, i32) {
    %c0_i32 = arith.constant 0 : i32
    %c0_i32_0 = arith.constant 0 : i32
    return %arg0, %c0_i32 : i32, i32
  }
  func.func @transform_1(%arg0: i32) -> (i32, i32) {
    %c0_i32 = arith.constant 0 : i32
    %c0_i32_0 = arith.constant 0 : i32
    return %arg0, %c0_i32 : i32, i32
  }
  func.func @transform_2(%arg0: i32) -> (i32, i32) {
    %c0_i32 = arith.constant 0 : i32
    %c0_i32_0 = arith.constant 0 : i32
    return %arg0, %c0_i32 : i32, i32
  }
}

</mosaic_0001>

<bundles_post_ra>
// kernel: tpu_custom_call.1
= control target key start
LH: loop header
LB: loop body
LE: loop exit
PB: predicated region body
PF: predicated region fallthrough
CT: control target
= control target key end

     0   :  { %7 = vsyncpa [#allocation3], 0  ;;  %s327_s0 = inlined_call_operand.hbm [shape: f32[2,256], index: 0, kind: input, shape index: {}]   ;;  %s328_s1 = inlined_call_operand.hbm [shape: f32[2,256], index: 1, kind: input, shape index: {}]   ;;  %s329_s2 = inlined_call_operand.hbm [shape: f32[1,1], index: 2, kind: output, shape index: {}]  }
   0x1   :  { %8 = vsyncpa [#allocation6], 0 }
   0x2   :  { %9 = vsyncpa [#allocation4], 0 }
   0x3   :  { %13 = vsyncadd [#allocation3], 192  ;;  %s14_s11 = sshll.u32 %s327_s0, 4  ;;  %s294_s12 = smov [#allocation2]   ;;  %s15_s11 = int_to_ptr.hbm [resolvable:$true] %s14_s11 }
   0x4   :  { %s16_s13 = sshll.u32 %s294_s12, 4  ;;  %s295_s14 = smov 64   ;;  %s17_s13 = int_to_ptr.vmem [resolvable:$true] %s16_s13 }
   0x5   :  { %s296_s15 = smov 4  }
   0x6   :  { %22 = dma.hbm_to_vmem [thread:$0]  %s15_s11, 64, %s17_s13, [#allocation3], %s295_s14, %s295_s14, %s296_s15  }
   0x7   :  { %26 = vsyncadd [#allocation6], 192  ;;  %s27_s18 = sshll.u32 %s328_s1, 4  ;;  %s297_s19 = smov [#allocation5]   ;;  %s28_s18 = int_to_ptr.hbm [resolvable:$true] %s27_s18 }
   0x8   :  { %s29_s20 = sshll.u32 %s297_s19, 4  ;;  %s30_s20 = int_to_ptr.vmem [resolvable:$true] %s29_s20 }
   0x9   :  { %35 = dma.hbm_to_vmem [thread:$0]  %s28_s18, 64, %s30_s20, [#allocation6], %s295_s14, %s295_s14, %s296_s15  }
   0xa   :  { %288 = dma.done.wait [#allocation3], 256  }
   0xb   :  { %289 = vsyncadd [#allocation3], 4294967040 }
   0xc   :  { %290 = dma.done.wait [#allocation6], 256  }
   0xd   :  { %291 = vsyncadd [#allocation6], 4294967040  ;;  %v44_v0 = vld [vmem:[#allocation2] sm:$0xf]  ;;  %v45_v1 = vld [vmem:[#allocation2 + $0x4] sm:$0xf]  ;;  %v154_v54 = vlaneseq }
   0xe   :  { %v46_v2 = vld [vmem:[#allocation2 + $0x8] sm:$0xf]  ;;  %v47_v3 = vld [vmem:[#allocation2 + $0xc] sm:$0xf]  ;;  %56 = vst [vmem:[#allocation1] ss:$4 sm:$0xff] %v44_v0 }
   0xf   :  { %58 = vst [vmem:[#allocation1 + $0x1] ss:$4 sm:$0xff] %v45_v1  ;;  %v298_v7 = vmov 269488144   ;;  %v299_v9 = vmov 842150450  }
  0x10   :  { %60 = vst [vmem:[#allocation1 + $0x2] ss:$4 sm:$0xff] %v46_v2  ;;  %v72_v8 = vunpack.c.l.s4 %v298_v7  ;;  %v76_v10 = vunpack.c.l.s4 %v299_v9  ;;  %v300_v11 = vmov 1414812756   ;;  %v301_v13 = vmov 1987475062  }
  0x11   :  { %62 = vst [vmem:[#allocation1 + $0x3] ss:$4 sm:$0xff] %v47_v3  ;;  %v80_v12 = vunpack.c.l.s4 %v300_v11  ;;  %v84_v14 = vunpack.c.l.s4 %v301_v13  ;;  %v48_v36 = vld [vmem:[#allocation5] sm:$0xf]  ;;  %v49_v37 = vld [vmem:[#allocation5 + $0x4] sm:$0xf] }
  0x12   :  { %v73_v15 = vunpack.c.0.s8 %v72_v8  ;;  %v77_v16 = vunpack.c.0.s8 %v76_v10  ;;  %v50_v38 = vld [vmem:[#allocation5 + $0x8] sm:$0xf]  ;;  %v51_v39 = vld [vmem:[#allocation5 + $0xc] sm:$0xf]  ;;  %vm121_vm0 = vcmp.ge.f32.partialorder %v48_v36, 0.05 }
  0x13   :  { %v81_v17 = vunpack.c.0.s8 %v80_v12  ;;  %v85_v18 = vunpack.c.0.s8 %v84_v14  ;;  %vm122_vm1 = vcmp.ge.f32.partialorder %v49_v37, 0.05  ;;  %vm123_vm2 = vcmp.ge.f32.partialorder %v50_v38, 0.05  ;;  %s302_s0 = smov [#allocation7]   ;;  %s182_s23 = sshll.u32 %s329_s2, 4  ;;  %s183_s23 = int_to_ptr.hbm [resolvable:$true] %s182_s23 }
  0x14   :  { %vm124_vm3 = vcmp.ge.f32.partialorder %v51_v39, 0.05  ;;  %v155_v56 = vshrl.u32 %v154_v54, 7  ;;  %vm161_vm5 = vcmask 7168   ;;  %s180_s1 = sshll.u32 %s302_s0, 4  ;;  %vm173_vm6 = vcmask 0   ;;  %s181_s1 = int_to_ptr.vmem [resolvable:$true] %s180_s1 }
  0x16   :  { %vm159_vm4 = vcmp.lt.s32.totalorder %v155_v56, 2 }
  0x18   :  { %v63_v4 = vld.sshfl [vmem:[#allocation1] sm:$0xff pattern:$0x73625140]  ;;  %v64_v5 = vld.sshfl [vmem:[#allocation1 + $0x8] sm:$0xff pattern:$0x73625140] }
  0x19   :  { %v67_v6 = vmax.f32 %v63_v4, %v64_v5 }
  0x1b   :  { %68 = vmax.xlane.f32.xlu0 %v67_v6 }
  0x8e   :  { %v69_v19 = vpop.xlane.xlu0 %68 }
  0x8f   :  { %v74_v20 = vperm.slane %v69_v19, %v73_v15  ;;  %v78_v21 = vperm.slane %v69_v19, %v77_v16  ;;  %v82_v22 = vperm.slane %v69_v19, %v81_v17  ;;  %v86_v23 = vperm.slane %v69_v19, %v85_v18 }
  0x91   :  { %v91_v24 = vsub.f32 %v44_v0, %v74_v20  ;;  %v92_v25 = vsub.f32 %v45_v1, %v78_v21  ;;  %v93_v26 = vsub.f32 %v46_v2, %v82_v22  ;;  %v94_v27 = vsub.f32 %v47_v3, %v86_v23 }
  0x93   :  { %v95_v28 = vmul.f32 1.442695, %v91_v24  ;;  %v97_v29 = vmul.f32 1.442695, %v92_v25  ;;  %v99_v30 = vmul.f32 1.442695, %v93_v26 }
  0x94   :  { %v101_v31 = vmul.f32 1.442695, %v94_v27 }
  0x95   :  { %204 = vpow2.f32 %v95_v28 }
  0x96   :  { %206 = vpow2.f32 %v97_v29 }
  0x97   :  { %208 = vpow2.f32 %v99_v30 }
  0x98   :  { %210 = vpow2.f32 %v101_v31 }
  0x9b   :  { %v205_v32 = vpop.eup %204 }
  0x9c   :  { %v207_v33 = vpop.eup %206  ;;  %107 = vst [vmem:[#allocation1] ss:$4 sm:$0xff] %v205_v32  ;;  %v125_v40 = vsel %vm121_vm0, %v205_v32, 0.0 }
  0x9d   :  { %v209_v34 = vpop.eup %208  ;;  %109 = vst [vmem:[#allocation1 + $0x1] ss:$4 sm:$0xff] %v207_v33  ;;  %v126_v43 = vsel %vm122_vm1, %v207_v33, 0.0 }
  0x9e   :  { %v211_v35 = vpop.eup %210  ;;  %111 = vst [vmem:[#allocation1 + $0x2] ss:$4 sm:$0xff] %v209_v34  ;;  %v127_v45 = vsel %vm123_vm2, %v209_v34, 0.0 }
  0x9f   :  { %113 = vst [vmem:[#allocation1 + $0x3] ss:$4 sm:$0xff] %v211_v35  ;;  %v128_v46 = vsel %vm124_vm3, %v211_v35, 0.0 }
  0xa6   :  { %v114_v41 = vld.sshfl [vmem:[#allocation1] sm:$0xff pattern:$0x73625140]  ;;  %v115_v42 = vld.sshfl [vmem:[#allocation1 + $0x8] sm:$0xff pattern:$0x73625140] }
  0xa7   :  { %v118_v44 = vadd.f32 %v115_v42, %v114_v41  ;;  %133 = vst [vmem:[#allocation1] ss:$4 sm:$0xff] %v125_v40 }
  0xa8   :  { %135 = vst [vmem:[#allocation1 + $0x1] ss:$4 sm:$0xff] %v126_v43 }
  0xa9   :  { %137 = vst [vmem:[#allocation1 + $0x2] ss:$4 sm:$0xff] %v127_v45  ;;  %119 = vadd.xlane.f32.xlu0 %v118_v44 }
  0xaa   :  { %139 = vst [vmem:[#allocation1 + $0x3] ss:$4 sm:$0xff] %v128_v46 }
  0xb1   :  { %v140_v47 = vld.sshfl [vmem:[#allocation1] sm:$0xff pattern:$0x73625140]  ;;  %v141_v48 = vld.sshfl [vmem:[#allocation1 + $0x8] sm:$0xff pattern:$0x73625140] }
  0xb2   :  { %v144_v49 = vadd.f32 %v141_v48, %v140_v47 }
  0xb4   :  { %145 = vadd.xlane.f32.xlu1 %v144_v49 }
 0x11c   :  { %v120_v50 = vpop.xlane.xlu0 %119 }
 0x11d   :  { %v147_v51 = vmax.f32 %v120_v50, 1e-07 }
 0x11f   :  { %212 = vlog2.f32 %v147_v51 }
 0x125   :  { %v213_v55 = vpop.eup %212 }
 0x126   :  { %v149_v58 = vmul.f32 0.6931472, %v213_v55 }
 0x127   :  { %v146_v52 = vpop.xlane.xlu1 %145 }
 0x128   :  { %v150_v53 = vmax.f32 %v146_v52, 1e-07 }
 0x12a   :  { %214 = vlog2.f32 %v150_v53 }
 0x130   :  { %v215_v57 = vpop.eup %214 }
 0x131   :  { %v152_v59 = vmul.f32 0.6931472, %v215_v57 }
 0x133   :  { %v153_v60 = vsub.f32 %v149_v58, %v152_v59 }
 0x135   :  { %v160_v61 = vsel %vm159_vm4, %v153_v60, 0.0 }
 0x136   :  { %v162_v62 = vsel %vm161_vm5, %v160_v61, 0.0 }
 0x137   :  { %163 = vadd.xlane.f32.xlu1 %v162_v62 }
 0x1aa   :  { %v164_v63 = vpop.xlane.xlu1 %163 }
 0x1ab   :  { %v165_v0 = vrot.slane %v164_v63, 4 }
 0x1ad   :  { %v166_v1 = vadd.f32 %v165_v0, %v164_v63 }
 0x1af   :  { %v167_v2 = vrot.slane %v166_v1, 2 }
 0x1b1   :  { %v168_v3 = vadd.f32 %v167_v2, %v166_v1 }
 0x1b3   :  { %v169_v4 = vrot.slane %v168_v3, 1 }
 0x1b5   :  { %v170_v5 = vadd.f32 %v169_v4, %v168_v3 }
 0x1b7   :  { %193 = vpush %v170_v5 }
 0x1e8   :  { %s194_s24 = spop %193 }
 0x1e9   :  { %v172_v6 = vstv %s194_s24 }
 0x1ea   :  { %174 = vst.msk [vmem:[#allocation7] sm:$0x1] %vm173_vm6, %v172_v6 }
 0x1eb   :  { %185 = dma.vmem_to_hbm [thread:$0]  %s181_s1, 16, %s183_s23, [#allocation4]  }
 0x1ec   :  { %292 = dma.done.wait [#allocation4], 16  }
 0x1ed   :  { %293 = vsyncadd [#allocation4], 4294967280 }
 0x1ee   :  { %190 = vsyncpa [#allocation3], 1 }
 0x1ef   :  { %191 = vsyncpa [#allocation6], 1 }
 0x1f0   :  { %192 = vsyncpa [#allocation4], 1 }

</bundles_post_ra>
